<compile_context>
chip_gen: v7x
topology: tpu7x:2x2x1
jax: 0.10.0
libtpu: 0.0.40
codegen_flags: <defaults>
</compile_context>

<pallas_src>
import numpy as np
import jax
import jax.numpy as jnp
from jax.experimental import pallas as pl
from jax.experimental.pallas import tpu as pltpu

KH = KW = 3          # conv kernel
C_IN = 3
C_OUT = 12
POOL = 3             # maxpool kernel == stride
LANES = 128          # output channels zero-padded to one full lane tile


def conv_pool_kernel(p_ref, w_ref, b_ref, o_ref):
    """Fused conv (im2col matmul) + 3x3/3 max-pool + bias for a block of images.

    p_ref: (9, B*PP, K)  bf16 patches; axis0 = pool-window offset q = dr*3+dc,
                         axis1 row = b*PP + (ph*PW + pw), axis2 = (kh, kw, ci)
    w_ref: (K, 128)      bf16 conv weight, zero-padded to 128 output lanes
    b_ref: (1, 128)      f32 bias, zero-padded
    o_ref: (B*PP, 128)   pooled output (row = b*PP + ph*PW + pw), lane-dense
    """
    nq, rows, k = p_ref.shape

    # Single MXU pass for the whole block: (9*B*PP, K) @ (K, 128), f32 accumulation.
    # rows % 8 == 0, so merging the leading pool-offset axis is tile-aligned (free).
    lhs = p_ref[...].reshape(nq * rows, k)
    conv = jnp.dot(lhs, w_ref[...], preferred_element_type=jnp.float32)

    # MaxPool: rows [q*rows, (q+1)*rows) hold the conv values for pool offset q,
    # so pooling is a balanced pairwise-max tree (depth 4) over 9 aligned slabs.
    slabs = [conv[q * rows:(q + 1) * rows, :] for q in range(nq)]
    while len(slabs) > 1:
        nxt = [jnp.maximum(slabs[i], slabs[i + 1])
               for i in range(0, len(slabs) - 1, 2)]
        if len(slabs) % 2:
            nxt.append(slabs[-1])
        slabs = nxt

    # Bias commutes with max (per-channel constant); add once, one dense store.
    o_ref[...] = (slabs[0] + b_ref[...]).astype(o_ref.dtype)


def _images_per_step(n, pp, k):
    """Pick how many images share one grid step (VMEM-aware, megacore-aware)."""
    # Per-image bytes per pipeline buffer: bf16 patches + f32 output block.
    per_img = POOL * POOL * pp * k * 2 + pp * LANES * 4
    budget = 16 << 20            # stays well under scoped-VMEM defaults (v7x: 32 of 64 MiB)
    b = max(1, min(n, budget // (2 * per_img)))   # x2: double buffering
    if n >= 8:                   # keep >=2 grid steps so both v7x TensorCores get work
        b = min(b, n // 2)
    while n % b:                 # static BlockSpecs need an even split
        b -= 1
    return b


@jax.jit
def my_module_forward(x_nchw, w_oihw, bias):
    """x: (N, 3, H, W), w: (12, 3, 3, 3), b: (12,) -> (N, 12, PH, PW)."""
    N, C, H, W = x_nchw.shape
    OH, OW = H - KH + 1, W - KW + 1
    PH, PW = OH // POOL, OW // POOL
    PP = PH * PW
    K = KH * KW * C
    ch, cw = PH * POOL, PW * POOL        # floor-mode pool uses only this crop

    # Pool-offset-major bf16 im2col, built straight from NCHW (no NHWC transpose):
    # one stack of 9 shifted, pre-cropped slabs + one transpose.
    xb = x_nchw.astype(jnp.bfloat16)
    slabs = [xb[:, :, kh:kh + ch, kw:kw + cw]
             for kh in range(KH) for kw in range(KW)]
    st = jnp.stack(slabs, axis=1)                         # (N, 9kk, C, ch, cw)
    st = st.reshape(N, KH * KW, C, PH, POOL, PW, POOL)    # split pool phases (free)
    pq = jnp.transpose(st, (4, 6, 0, 3, 5, 1, 2))         # (dr, dc, N, ph, pw, kk, ci)
    patches = pq.reshape(POOL * POOL, N * PP, K)          # (9, N*PP, 27) bf16

    # (O, I, KH, KW) -> (KH, KW, I, O) -> (K, O); zero-pad to 128 lanes so the
    # kernel's store is lane-dense (extra MXU lanes are free at this size).
    w_mat = jnp.transpose(w_oihw, (2, 3, 1, 0)).reshape(K, C_OUT).astype(jnp.bfloat16)
    w_pad = jnp.zeros((K, LANES), jnp.bfloat16).at[:, :C_OUT].set(w_mat)
    b_pad = jnp.zeros((1, LANES), jnp.float32).at[:, :C_OUT].set(bias.astype(jnp.float32))

    B = _images_per_step(N, PP, K)       # N=2 -> B=2 -> grid=(1,): one matmul
    steps = N // B

    out = pl.pallas_call(
        conv_pool_kernel,
        out_shape=jax.ShapeDtypeStruct((N * PP, LANES), x_nchw.dtype),
        grid=(steps,),
        in_specs=[
            pl.BlockSpec((POOL * POOL, B * PP, K), lambda i: (0, i, 0)),
            pl.BlockSpec((K, LANES), lambda i: (0, 0)),
            pl.BlockSpec((1, LANES), lambda i: (0, 0)),
        ],
        out_specs=pl.BlockSpec((B * PP, LANES), lambda i: (i, 0)),
        compiler_params=pltpu.CompilerParams(dimension_semantics=("parallel",)),
    )(patches, w_pad, b_pad)

    out = out.reshape(N, PH, PW, LANES)[..., :C_OUT]      # drop padded lanes
    return jnp.transpose(out, (0, 3, 1, 2))               # NHWC -> NCHW


def _reference(x_nchw, w_oihw, bias):
    conv = jax.lax.conv_general_dilated(
        x_nchw, w_oihw, window_strides=(1, 1), padding="VALID",
        dimension_numbers=("NCHW", "OIHW", "NCHW"))
    conv = conv + bias.reshape(1, C_OUT, 1, 1)
    return jax.lax.reduce_window(
        conv, -jnp.inf, jax.lax.max,
        window_dimensions=(1, 1, POOL, POOL),
        window_strides=(1, 1, POOL, POOL),
        padding="VALID")


if __name__ == "__main__":
    key = jax.random.PRNGKey(0)
    kx, kw, kb = jax.random.split(key, 3)

    # Small deterministic inputs / parameters (synthetic, not a checkpoint).
    x = jax.random.normal(kx, (2, C_IN, 16, 16), dtype=jnp.float32)
    w = jax.random.normal(kw, (C_OUT, C_IN, KH, KW), dtype=jnp.float32) * 0.1
    b = jax.random.normal(kb, (C_OUT,), dtype=jnp.float32) * 0.1

    y = jax.block_until_ready(my_module_forward(x, w, b))
    assert y.shape == (2, C_OUT, 4, 4), y.shape

    y_ref = jax.block_until_ready(_reference(x, w, b))
    # bf16 operands on the MXU (f32 accumulation): expected abs error ~1e-3 here.
    assert jnp.allclose(y, y_ref, atol=2e-2, rtol=2e-2), \
        float(jnp.max(jnp.abs(y - y_ref)))

    print("KERNEL_OK")
</pallas_src>

<mosaic_0001>
module attributes {stable_mosaic.version = 11 : i64} {
  func.func @conv_pool_kernel(%arg0: i32, %arg1: memref<9x32x27xbf16, #tpu.memory_space<vmem>>, %arg2: memref<27x128xbf16, #tpu.memory_space<vmem>>, %arg3: memref<1x128xf32, #tpu.memory_space<vmem>>, %arg4: memref<32x128xf32, #tpu.memory_space<vmem>>) attributes {dimension_semantics = [#tpu.dimension_semantics<parallel>], iteration_bounds = array<i64: 1>, scalar_prefetch = 0 : i64, scratch_operands = 0 : i64, tpu.core_type = #tpu.core_type<tc>, window_params = [{transform_indices = @transform_0, window_bounds = array<i64: 9, 32, 27>}, {pipeline_mode = #tpu.pipeline_mode<synchronous>, transform_indices = @transform_1, window_bounds = array<i64: 27, 128>}, {pipeline_mode = #tpu.pipeline_mode<synchronous>, transform_indices = @transform_2, window_bounds = array<i64: 1, 128>}, {transform_indices = @transform_3, window_bounds = array<i64: 32, 128>}]} {
    %c0 = arith.constant 0 : index
    %c0_0 = arith.constant 0 : index
    %c0_1 = arith.constant 0 : index
    %0 = vector.load %arg1[%c0, %c0_0, %c0_1] : memref<9x32x27xbf16, #tpu.memory_space<vmem>>, vector<9x32x27xbf16>
    %1 = vector.shape_cast %0 : vector<9x32x27xbf16> to vector<288x27xbf16>
    %c0_2 = arith.constant 0 : index
    %c0_3 = arith.constant 0 : index
    %2 = vector.load %arg2[%c0_2, %c0_3] : memref<27x128xbf16, #tpu.memory_space<vmem>>, vector<27x128xbf16>
    %cst = arith.constant dense<0.000000e+00> : vector<288x128xf32>
    %3 = tpu.matmul %1, %2, %cst {dimension_numbers = #tpu.dot_dimension_numbers<[1], [0], [0], [1], [0, 0, 1, 1], [], []>} : vector<288x27xbf16>, vector<27x128xbf16>, vector<288x128xf32> -> vector<288x128xf32>
    %4 = vector.extract_strided_slice %3 {offsets = [0, 0], sizes = [32, 128], strides = [1, 1]} : vector<288x128xf32> to vector<32x128xf32>
    %5 = vector.extract_strided_slice %3 {offsets = [32, 0], sizes = [32, 128], strides = [1, 1]} : vector<288x128xf32> to vector<32x128xf32>
    %6 = vector.extract_strided_slice %3 {offsets = [64, 0], sizes = [32, 128], strides = [1, 1]} : vector<288x128xf32> to vector<32x128xf32>
    %7 = vector.extract_strided_slice %3 {offsets = [96, 0], sizes = [32, 128], strides = [1, 1]} : vector<288x128xf32> to vector<32x128xf32>
    %8 = vector.extract_strided_slice %3 {offsets = [128, 0], sizes = [32, 128], strides = [1, 1]} : vector<288x128xf32> to vector<32x128xf32>
    %9 = vector.extract_strided_slice %3 {offsets = [160, 0], sizes = [32, 128], strides = [1, 1]} : vector<288x128xf32> to vector<32x128xf32>
    %10 = vector.extract_strided_slice %3 {offsets = [192, 0], sizes = [32, 128], strides = [1, 1]} : vector<288x128xf32> to vector<32x128xf32>
    %11 = vector.extract_strided_slice %3 {offsets = [224, 0], sizes = [32, 128], strides = [1, 1]} : vector<288x128xf32> to vector<32x128xf32>
    %12 = vector.extract_strided_slice %3 {offsets = [256, 0], sizes = [32, 128], strides = [1, 1]} : vector<288x128xf32> to vector<32x128xf32>
    %13 = arith.maximumf %4, %5 : vector<32x128xf32>
    %14 = arith.maximumf %6, %7 : vector<32x128xf32>
    %15 = arith.maximumf %8, %9 : vector<32x128xf32>
    %16 = arith.maximumf %10, %11 : vector<32x128xf32>
    %17 = arith.maximumf %13, %14 : vector<32x128xf32>
    %18 = arith.maximumf %15, %16 : vector<32x128xf32>
    %19 = arith.maximumf %17, %18 : vector<32x128xf32>
    %20 = arith.maximumf %19, %12 : vector<32x128xf32>
    %c0_4 = arith.constant 0 : index
    %c0_5 = arith.constant 0 : index
    %21 = vector.load %arg3[%c0_4, %c0_5] : memref<1x128xf32, #tpu.memory_space<vmem>>, vector<1x128xf32>
    %22 = vector.broadcast %21 : vector<1x128xf32> to vector<32x128xf32>
    %23 = arith.addf %20, %22 : vector<32x128xf32>
    %c0_6 = arith.constant 0 : index
    %c0_7 = arith.constant 0 : index
    %24 = vector.load %arg4[%c0_6, %c0_7] : memref<32x128xf32, #tpu.memory_space<vmem>>, vector<32x128xf32>
    tpu.vector_store %arg4[%c0_6, %c0_7], %23 {strides = array<i32>} : memref<32x128xf32, #tpu.memory_space<vmem>>, vector<32x128xf32>,
    return
  }
  func.func @transform_0(%arg0: i32) -> (i32, i32, i32) {
    %c0_i32 = arith.constant 0 : i32
    %c0_i32_0 = arith.constant 0 : i32
    %c0_i32_1 = arith.constant 0 : i32
    return %c0_i32, %arg0, %c0_i32_0 : i32, i32, i32
  }
  func.func @transform_1(%arg0: i32) -> (i32, i32) {
    %c0_i32 = arith.constant 0 : i32
    %c0_i32_0 = arith.constant 0 : i32
    %c0_i32_1 = arith.constant 0 : i32
    return %c0_i32, %c0_i32_0 : i32, i32
  }
  func.func @transform_2(%arg0: i32) -> (i32, i32) {
    %c0_i32 = arith.constant 0 : i32
    %c0_i32_0 = arith.constant 0 : i32
    %c0_i32_1 = arith.constant 0 : i32
    return %c0_i32, %c0_i32_0 : i32, i32
  }
  func.func @transform_3(%arg0: i32) -> (i32, i32) {
    %c0_i32 = arith.constant 0 : i32
    %c0_i32_0 = arith.constant 0 : i32
    return %arg0, %c0_i32 : i32, i32
  }
}

</mosaic_0001>

<bundles_post_ra>
// kernel: my_module_forward.1
= control target key start
LH: loop header
LB: loop body
LE: loop exit
PB: predicated region body
PF: predicated region fallthrough
CT: control target
= control target key end

     0   :  { %vm211_vm0 = vcmask 1044480   ;;  %vm212_vm1 = vcmask 1045504   ;;  %vm156_vm2 = vcmask 220160   ;;  %v570_v1 = vmov 65535   ;;  %s684_s1 = inlined_call_operand.vmem [shape: bf16[27,128], index: 1, kind: input, shape index: {}]   ;;  %s685_s0 = inlined_call_operand.vmem [shape: bf16[9,32,27], index: 0, kind: input, shape index: {}]   ;;  %s686_s2 = inlined_call_operand.vmem [shape: f32[1,128], index: 2, kind: input, shape index: {}]   ;;  %s687_s3 = inlined_call_operand.vmem [shape: f32[32,128], index: 3, kind: output, shape index: {}]  }
   0x1   :  { %v550_v0 = vld [vmem:[%s684_s1] sm:$0xff]   ;;  %v213_v2 = vsel %vm211_vm0, 4294967295, %v570_v1  ;;  %v551_v3 = vld [vmem:[%s684_s1 + $0x8] sm:$0x3f]   ;;  %v554_v7 = vld [vmem:[%s685_s0 + $0x50] sm:$0xff]  }
   0x2   :  { %505 = vmatprep.subr.bf16.mxu0 %v550_v0  ;;  %545 = vmatprep.subr.bf16.mxu1 %v550_v0  ;;  %v214_v4 = vsel %vm212_vm1, %v213_v2, 0  ;;  %v552_v5 = vld [vmem:[%s685_s0] sm:$0xff]   ;;  %v553_v8 = vld [vmem:[%s685_s0 + $0x8] sm:$0xff]   ;;  %v555_v9 = vld [vmem:[%s685_s0 + $0x58] sm:$0xff]  }
   0x3   :  { %506 = vmatpush3.bf16.msra.mxu0 %v550_v0  ;;  %547 = vmatpush3.bf16.msra.mxu1 %v550_v0  ;;  %v216_v6 = vand.u32 %v551_v3, %v214_v4  ;;  %v556_v10 = vld [vmem:[%s685_s0 + $0x10] sm:$0xff]   ;;  %v558_v11 = vld [vmem:[%s685_s0 + $0x60] sm:$0xff]   ;;  %v557_v12 = vld [vmem:[%s685_s0 + $0x18] sm:$0xff]  }
   0x4   :  { %509 = vmatprep.mubr.msk.bf16.mxu0 %vm156_vm2, %v552_v5  ;;  %529 = vmatprep.mubr.msk.bf16.mxu1 %vm156_vm2, %v554_v7  ;;  %v559_v13 = vld [vmem:[%s685_s0 + $0x68] sm:$0xff]   ;;  %v560_v14 = vld [vmem:[%s685_s0 + $0x20] sm:$0xff]   ;;  %v562_v15 = vld [vmem:[%s685_s0 + $0x70] sm:$0xff]  }
   0x5   :  { %507 = vmatprep.subr.bf16.mxu0 %v216_v6  ;;  %546 = vmatprep.subr.bf16.mxu1 %v216_v6  ;;  %v561_v16 = vld [vmem:[%s685_s0 + $0x28] sm:$0xff]   ;;  %v563_v17 = vld [vmem:[%s685_s0 + $0x78] sm:$0xff]   ;;  %v564_v18 = vld [vmem:[%s685_s0 + $0x30] sm:$0xff]  }
   0x6   :  { %v568_v19 = vld [vmem:[%s685_s0 + $0x80] sm:$0xff]   ;;  %v565_v20 = vld [vmem:[%s685_s0 + $0x38] sm:$0xff]   ;;  %v569_v21 = vld [vmem:[%s685_s0 + $0x88] sm:$0xff]  }
   0x7   :  { %508 = vmatpush3.bf16.msra.mxu0 %v216_v6  ;;  %548 = vmatpush3.bf16.msra.mxu1 %v216_v6  ;;  %v566_v22 = vld [vmem:[%s685_s0 + $0x40] sm:$0xff]   ;;  %v567_v23 = vld [vmem:[%s685_s0 + $0x48] sm:$0xff]  }
   0xa   :  { %510 = vmatmul.mubr.msk.bf16.vlgmr.msra.gmra.mrb[0].mxu0 %vm156_vm2, %v553_v8  ;;  %530 = vmatmul.mubr.msk.bf16.vlgmr.msra.gmra.mrb[0].mxu1 %vm156_vm2, %v555_v9 }
   0xb   :  { %513 = vmatprep.mubr.msk.bf16.mxu0 %vm156_vm2, %v556_v10  ;;  %533 = vmatprep.mubr.msk.bf16.mxu1 %vm156_vm2, %v558_v11 }
  0x12   :  { %514 = vmatmul.mubr.msk.bf16.gmra.mrb[4].mxu0 %vm156_vm2, %v557_v12  ;;  %534 = vmatmul.mubr.msk.bf16.gmra.mrb[4].mxu1 %vm156_vm2, %v559_v13 }
  0x13   :  { %517 = vmatprep.mubr.msk.bf16.mxu0 %vm156_vm2, %v560_v14  ;;  %537 = vmatprep.mubr.msk.bf16.mxu1 %vm156_vm2, %v562_v15 }
  0x1a   :  { %518 = vmatmul.mubr.msk.bf16.gmra.mrb[8].mxu0 %vm156_vm2, %v561_v16  ;;  %538 = vmatmul.mubr.msk.bf16.gmra.mrb[8].mxu1 %vm156_vm2, %v563_v17 }
  0x1b   :  { %521 = vmatprep.mubr.msk.bf16.mxu0 %vm156_vm2, %v564_v18  ;;  %541 = vmatprep.mubr.msk.bf16.mxu1 %vm156_vm2, %v568_v19 }
  0x22   :  { %522 = vmatmul.mubr.msk.bf16.gmra.mrb[12].mxu0 %vm156_vm2, %v565_v20  ;;  %542 = vmatmul.mubr.msk.bf16.gmra.mrb[12].mxu1 %vm156_vm2, %v569_v21  ;;  %v484_v21 = vld [vmem:[%s686_s2] ss:$0 sm:$0xff] }
  0x23   :  { %525 = vmatprep.mubr.msk.bf16.mxu0 %vm156_vm2, %v566_v22 }
  0x2a   :  { %526 = vmatmul.mubr.msk.bf16.gmra.mrb[16].mxu0 %vm156_vm2, %v567_v23 }
  0xdd   :  { %v511_v24 = vpop.f32.mrb[0].mxu0  ;;  %v531_v25 = vpop.f32.mrb[0].mxu1 }
  0xde   :  { %v252_v26 = vpop.f32.mrb[1].mxu0  ;;  %v332_v27 = vpop.f32.mrb[1].mxu1 }
  0xdf   :  { %v512_v28 = vpop.f32.mrb[2].mxu0  ;;  %v532_v29 = vpop.f32.mrb[2].mxu1 }
  0xe0   :  { %v255_v30 = vpop.f32.mrb[3].mxu0  ;;  %v335_v31 = vpop.f32.mrb[3].mxu1 }
  0xe5   :  { %v515_v32 = vpop.f32.mrb[4].mxu0  ;;  %v535_v33 = vpop.f32.mrb[4].mxu1 }
  0xe6   :  { %v397_v34 = vmax.f32 %v511_v24, %v515_v32  ;;  %v268_v35 = vpop.f32.mrb[5].mxu0  ;;  %v348_v36 = vpop.f32.mrb[5].mxu1 }
  0xe7   :  { %v395_v37 = vmax.f32 %v252_v26, %v268_v35  ;;  %v516_v38 = vpop.f32.mrb[6].mxu0  ;;  %v536_v39 = vpop.f32.mrb[6].mxu1 }
  0xe8   :  { %v398_v40 = vmax.f32 %v512_v28, %v516_v38  ;;  %v271_v41 = vpop.f32.mrb[7].mxu0  ;;  %v351_v42 = vpop.f32.mrb[7].mxu1 }
  0xe9   :  { %v396_v43 = vmax.f32 %v255_v30, %v271_v41 }
  0xed   :  { %v519_v44 = vpop.f32.mrb[8].mxu0  ;;  %v539_v45 = vpop.f32.mrb[8].mxu1 }
  0xee   :  { %v284_v46 = vpop.f32.mrb[9].mxu0  ;;  %v409_v47 = vmax.f32 %v535_v33, %v539_v45  ;;  %v364_v48 = vpop.f32.mrb[9].mxu1 }
  0xef   :  { %v520_v49 = vpop.f32.mrb[10].mxu0  ;;  %v407_v50 = vmax.f32 %v348_v36, %v364_v48  ;;  %v540_v51 = vpop.f32.mrb[10].mxu1 }
  0xf0   :  { %v287_v52 = vpop.f32.mrb[11].mxu0  ;;  %v410_v53 = vmax.f32 %v536_v39, %v540_v51  ;;  %v367_v54 = vpop.f32.mrb[11].mxu1 }
  0xf1   :  { %v408_v55 = vmax.f32 %v351_v42, %v367_v54 }
  0xf5   :  { %v523_v56 = vpop.f32.mrb[12].mxu0  ;;  %v543_v57 = vpop.f32.mrb[12].mxu1 }
  0xf6   :  { %v401_v58 = vmax.f32 %v519_v44, %v523_v56  ;;  %v300_v59 = vpop.f32.mrb[13].mxu0  ;;  %v380_v60 = vpop.f32.mrb[13].mxu1 }
  0xf7   :  { %v399_v61 = vmax.f32 %v284_v46, %v300_v59  ;;  %v524_v62 = vpop.f32.mrb[14].mxu0  ;;  %v544_v63 = vpop.f32.mrb[14].mxu1 }
  0xf8   :  { %v413_v0 = vmax.f32 %v397_v34, %v401_v58  ;;  %v402_v1 = vmax.f32 %v520_v49, %v524_v62  ;;  %v303_v2 = vpop.f32.mrb[15].mxu0  ;;  %v383_v3 = vpop.f32.mrb[15].mxu1 }
  0xf9   :  { %v411_v4 = vmax.f32 %v395_v37, %v399_v61  ;;  %v400_v5 = vmax.f32 %v287_v52, %v303_v2 }
  0xfa   :  { %v414_v6 = vmax.f32 %v398_v40, %v402_v1 }
  0xfb   :  { %v412_v7 = vmax.f32 %v396_v43, %v400_v5 }
  0xfd   :  { %v527_v8 = vpop.f32.mrb[16].mxu0 }
  0xfe   :  { %v405_v9 = vmax.f32 %v527_v8, %v531_v25  ;;  %v316_v10 = vpop.f32.mrb[17].mxu0 }
  0xff   :  { %v403_v11 = vmax.f32 %v316_v10, %v332_v27  ;;  %v528_v12 = vpop.f32.mrb[18].mxu0 }
 0x100   :  { %v417_v13 = vmax.f32 %v405_v9, %v409_v47  ;;  %v406_v14 = vmax.f32 %v528_v12, %v532_v29  ;;  %v319_v15 = vpop.f32.mrb[19].mxu0 }
 0x101   :  { %v415_v16 = vmax.f32 %v403_v11, %v407_v50  ;;  %v404_v17 = vmax.f32 %v319_v15, %v335_v31 }
 0x102   :  { %v418_v18 = vmax.f32 %v406_v14, %v410_v53  ;;  %v421_v19 = vmax.f32 %v413_v0, %v417_v13 }
 0x103   :  { %v416_v20 = vmax.f32 %v404_v17, %v408_v55  ;;  %v419_v22 = vmax.f32 %v411_v4, %v415_v16 }
 0x104   :  { %v425_v23 = vmax.f32 %v421_v19, %v543_v57  ;;  %v422_v24 = vmax.f32 %v414_v6, %v418_v18 }
 0x105   :  { %v423_v26 = vmax.f32 %v419_v22, %v380_v60  ;;  %v420_v25 = vmax.f32 %v412_v7, %v416_v20 }
 0x106   :  { %v436_v28 = vadd.f32 %v484_v21, %v425_v23  ;;  %v426_v27 = vmax.f32 %v422_v24, %v544_v63 }
 0x107   :  { %v434_v30 = vadd.f32 %v484_v21, %v423_v26  ;;  %v424_v32 = vmax.f32 %v420_v25, %v383_v3 }
 0x108   :  { %440 = vst [vmem:[%s687_s3 + $0x10] sm:$0xff] %v436_v28  ;;  %v437_v29 = vadd.f32 %v484_v21, %v426_v27 }
 0x109   :  { %438 = vst [vmem:[%s687_s3] sm:$0xff] %v434_v30  ;;  %v435_v31 = vadd.f32 %v484_v21, %v424_v32 }
 0x10a   :  { %441 = vst [vmem:[%s687_s3 + $0x18] sm:$0xff] %v437_v29 }
 0x10b   :  { %439 = vst [vmem:[%s687_s3 + $0x8] sm:$0xff] %v435_v31 }

</bundles_post_ra>
